<compile_context>
chip_gen: v7x
topology: tpu7x:2x2x1
jax: 0.10.0
libtpu: 0.0.40
codegen_flags: <defaults>
</compile_context>

<pallas_src>
import jax
import jax.numpy as jnp
from jax.experimental import pallas as pl
from jax.experimental.pallas import tpu as pltpu

_LANE = 128       # TPU lane width (last-dim tiling unit)
_SUBLANE = 8      # TPU sublane width (second-to-last-dim tiling unit)


def _round_up(x, m):
    return ((x + m - 1) // m) * m


def _autoencoder_kernel(x_ref, w1t_ref, b1_ref, w2t_ref, b2_ref, o_ref):
    # encoder: Linear + ReLU (f32 accumulation on the MXU)
    h = jnp.dot(x_ref[...], w1t_ref[...], preferred_element_type=jnp.float32)
    h = jnp.maximum(h + b1_ref[...], 0.0)          # (TM, Hp) + (1, Hp) broadcast, f32
    # Keep the f32 accumulator between layers; only drop precision if the caller
    # deliberately supplied sub-f32 (e.g. bf16) decoder weights for MXU throughput.
    if w2t_ref.dtype != jnp.float32:
        h = h.astype(w2t_ref.dtype)
    # decoder: Linear + Sigmoid (bias-add and sigmoid in f32; cast only at the store)
    y = jnp.dot(h, w2t_ref[...], preferred_element_type=jnp.float32)
    y = y + b2_ref[...]                            # (TM, D) + (1, D) broadcast, f32
    o_ref[...] = jax.nn.sigmoid(y).astype(o_ref.dtype)


def prepare_params(w1, b1, w2, b2, dtype=None):
    """One-time parameter prep (hoisted out of the per-call path).

    w1: (hidden, input)  b1: (hidden,)  w2: (input, hidden)  b2: (input,)

    Weights are pre-transposed to (in, out) layout.  Only the HIDDEN dim is padded
    to the 128-lane width (padded hidden columns see bias 0 -> ReLU 0 and multiply
    zero rows of W2^T, so they contribute exactly 0).  The input dim is left
    unpadded so activations can stream HBM<->VMEM without 8x lane inflation.
    Biases stay in f32 (added to the f32 accumulator).  `dtype` optionally casts
    the weights (e.g. jnp.bfloat16) for the MXU-native / half-HBM-traffic path.
    """
    hidden_dim, input_dim = w1.shape
    d_h_p = _round_up(hidden_dim, _LANE)
    if dtype is None:
        dtype = w1.dtype

    w1t = jnp.zeros((input_dim, d_h_p), dtype).at[:, :hidden_dim].set(w1.T.astype(dtype))
    b1p = jnp.zeros((1, d_h_p), jnp.float32).at[0, :hidden_dim].set(b1.astype(jnp.float32))
    w2t = jnp.zeros((d_h_p, input_dim), dtype).at[:hidden_dim, :].set(w2.T.astype(dtype))
    b2p = b2.astype(jnp.float32).reshape(1, input_dim)
    return w1t, b1p, w2t, b2p


def muscle_synergy_autoencoder_forward(x, params, *, block_m=4096):
    """x: (N, input_dim); params from prepare_params(). Returns (N, input_dim)."""
    w1t, b1p, w2t, b2p = params
    n, input_dim = x.shape
    d_h_p = w1t.shape[1]
    assert w1t.shape[0] == input_dim and w2t.shape == (d_h_p, input_dim)

    # bf16 I/O path: match activations to the (possibly bf16) weight dtype.
    if x.dtype != w1t.dtype:
        x = x.astype(w1t.dtype)

    # Batch tile: multiple of the 8-row sublane unit, capped at block_m, and capped
    # near half the batch so the "parallel" grid axis has >= 2 steps whenever the
    # batch allows it (v7x megacore: both TensorCores get work).  No padding of N:
    # grid = cdiv(N, tm); Pallas clips the final partial block, and rows are
    # independent, so its garbage rows only produce discarded output rows.
    tm_cap = _round_up(max(block_m, _SUBLANE), _SUBLANE)
    half_n = _round_up(pl.cdiv(n, 2), _SUBLANE) if n > _SUBLANE else _SUBLANE
    tm = max(min(tm_cap, half_n), _SUBLANE)
    grid_m = pl.cdiv(n, tm)

    # Explicit VMEM budget: double-buffered in/out activation tiles, resident
    # (double-buffered) weights/biases, f32 intermediate h, + headroom.  Kept well
    # under the 64 MiB physical VMEM of v7x.
    itemsize = jnp.dtype(x.dtype).itemsize
    act_bytes = 2 * 2 * tm * input_dim * itemsize                        # x + out, 2-deep
    w_bytes = 2 * sum(int(p.size) * jnp.dtype(p.dtype).itemsize
                      for p in (w1t, b1p, w2t, b2p))
    h_bytes = 2 * tm * d_h_p * 4                                         # f32 intermediate
    vmem_limit = int(min(max(act_bytes + w_bytes + h_bytes + (4 << 20), 8 << 20), 64 << 20))

    out = pl.pallas_call(
        _autoencoder_kernel,
        out_shape=jax.ShapeDtypeStruct((n, input_dim), x.dtype),
        grid=(grid_m,),
        in_specs=[
            pl.BlockSpec((tm, input_dim), lambda i: (i, 0)),     # x: streamed per tile
            pl.BlockSpec(w1t.shape, lambda i: (0, 0)),           # W1^T: resident
            pl.BlockSpec(b1p.shape, lambda i: (0, 0)),           # b1:   resident
            pl.BlockSpec(w2t.shape, lambda i: (0, 0)),           # W2^T: resident
            pl.BlockSpec(b2p.shape, lambda i: (0, 0)),           # b2:   resident
        ],
        out_specs=pl.BlockSpec((tm, input_dim), lambda i: (i, 0)),
        compiler_params=pltpu.CompilerParams(
            dimension_semantics=("parallel",),                   # megacore-shard batch tiles
            vmem_limit_bytes=vmem_limit,
        ),
    )(x, w1t, b1p, w2t, b2p)
    return out


def _torch_linear_init(key, out_features, in_features):
    """Deterministic stand-in for nn.Linear default init: U(-1/sqrt(fan_in), 1/sqrt(fan_in))."""
    kw, kb = jax.random.split(key)
    bound = 1.0 / (in_features ** 0.5)
    w = jax.random.uniform(kw, (out_features, in_features), jnp.float32, -bound, bound)
    b = jax.random.uniform(kb, (out_features,), jnp.float32, -bound, bound)
    return w, b


def _reference_forward(x, w1, b1, w2, b2):
    h = jnp.maximum(x @ w1.T + b1, 0.0)
    return jax.nn.sigmoid(h @ w2.T + b2)


# TODO(synk): fit()/reconstruct()/plotting (Adam training loop, MSE loss, matplotlib)
# are host-side training/visualization code with no Pallas forward-pass equivalent.

if __name__ == "__main__":
    # Small shapes consistent with the module: N samples of EMG envelopes
    # (input_dim channels), compressed to hidden_dim synergies.
    N, INPUT_DIM, HIDDEN_DIM = 8, 16, 32

    key = jax.random.PRNGKey(0)
    kx, k1, k2 = jax.random.split(key, 3)

    x = jax.random.uniform(kx, (N, INPUT_DIM), jnp.float32)      # EMG envelopes in [0,1)
    w1, b1 = _torch_linear_init(k1, HIDDEN_DIM, INPUT_DIM)       # encoder Linear
    w2, b2 = _torch_linear_init(k2, INPUT_DIM, HIDDEN_DIM)       # decoder Linear

    params = prepare_params(w1, b1, w2, b2)                      # one-time prep (f32)

    out = muscle_synergy_autoencoder_forward(x, params)
    out = jax.block_until_ready(out)

    ref = _reference_forward(x, w1, b1, w2, b2)
    assert out.shape == (N, INPUT_DIM)
    assert jnp.allclose(out, ref, atol=1e-5, rtol=1e-5), "mismatch vs reference (small)"

    # Second check: a longer EMG window exercising a multi-step batch grid with a
    # ragged final tile (N not a multiple of tm, partial-block rows discarded).
    N2 = 200
    x2 = jax.random.uniform(jax.random.PRNGKey(1), (N2, INPUT_DIM), jnp.float32)
    out2 = jax.block_until_ready(
        muscle_synergy_autoencoder_forward(x2, params, block_m=64))
    ref2 = _reference_forward(x2, w1, b1, w2, b2)
    assert out2.shape == (N2, INPUT_DIM)
    assert jnp.allclose(out2, ref2, atol=1e-5, rtol=1e-5), "mismatch vs reference (tiled)"

    # Third check: optional bf16 I/O path (halves HBM traffic; f32 accumulation and
    # f32 bias-add/sigmoid preserved; cast only at the store).  Loose tolerance.
    params_bf16 = prepare_params(w1, b1, w2, b2, dtype=jnp.bfloat16)
    out3 = jax.block_until_ready(
        muscle_synergy_autoencoder_forward(x2, params_bf16))
    assert out3.shape == (N2, INPUT_DIM) and out3.dtype == jnp.bfloat16
    assert jnp.allclose(out3.astype(jnp.float32), ref2, atol=5e-2), "mismatch (bf16 path)"

    print("KERNEL_OK")
</pallas_src>

<mosaic_0001>
module attributes {stable_mosaic.version = 11 : i64} {
  func.func @_autoencoder_kernel(%arg0: i32, %arg1: memref<8x16xf32, #tpu.memory_space<vmem>>, %arg2: memref<16x128xf32, #tpu.memory_space<vmem>>, %arg3: memref<1x128xf32, #tpu.memory_space<vmem>>, %arg4: memref<128x16xf32, #tpu.memory_space<vmem>>, %arg5: memref<1x16xf32, #tpu.memory_space<vmem>>, %arg6: memref<8x16xf32, #tpu.memory_space<vmem>>) attributes {dimension_semantics = [#tpu.dimension_semantics<parallel>], iteration_bounds = array<i64: 1>, scalar_prefetch = 0 : i64, scratch_operands = 0 : i64, tpu.core_type = #tpu.core_type<tc>, window_params = [{transform_indices = @transform_0, window_bounds = array<i64: 8, 16>}, {pipeline_mode = #tpu.pipeline_mode<synchronous>, transform_indices = @transform_1, window_bounds = array<i64: 16, 128>}, {pipeline_mode = #tpu.pipeline_mode<synchronous>, transform_indices = @transform_2, window_bounds = array<i64: 1, 128>}, {pipeline_mode = #tpu.pipeline_mode<synchronous>, transform_indices = @transform_3, window_bounds = array<i64: 128, 16>}, {pipeline_mode = #tpu.pipeline_mode<synchronous>, transform_indices = @transform_4, window_bounds = array<i64: 1, 16>}, {transform_indices = @transform_5, window_bounds = array<i64: 8, 16>}]} {
    %c0 = arith.constant 0 : index
    %c0_0 = arith.constant 0 : index
    %0 = vector.load %arg1[%c0, %c0_0] : memref<8x16xf32, #tpu.memory_space<vmem>>, vector<8x16xf32>
    %c0_1 = arith.constant 0 : index
    %c0_2 = arith.constant 0 : index
    %1 = vector.load %arg2[%c0_1, %c0_2] : memref<16x128xf32, #tpu.memory_space<vmem>>, vector<16x128xf32>
    %cst = arith.constant dense<0.000000e+00> : vector<8x128xf32>
    %2 = tpu.matmul %0, %1, %cst {dimension_numbers = #tpu.dot_dimension_numbers<[1], [0], [0], [1], [0, 0, 1, 1], [], []>} : vector<8x16xf32>, vector<16x128xf32>, vector<8x128xf32> -> vector<8x128xf32>
    %c0_3 = arith.constant 0 : index
    %c0_4 = arith.constant 0 : index
    %3 = vector.load %arg3[%c0_3, %c0_4] : memref<1x128xf32, #tpu.memory_space<vmem>>, vector<1x128xf32>
    %4 = vector.broadcast %3 : vector<1x128xf32> to vector<8x128xf32>
    %5 = arith.addf %2, %4 : vector<8x128xf32>
    %cst_5 = arith.constant 0.000000e+00 : f32
    %6 = vector.broadcast %cst_5 : f32 to vector<8x128xf32>
    %7 = arith.maximumf %5, %6 : vector<8x128xf32>
    %c0_6 = arith.constant 0 : index
    %c0_7 = arith.constant 0 : index
    %8 = vector.load %arg4[%c0_6, %c0_7] : memref<128x16xf32, #tpu.memory_space<vmem>>, vector<128x16xf32>
    %cst_8 = arith.constant dense<0.000000e+00> : vector<8x16xf32>
    %9 = tpu.matmul %7, %8, %cst_8 {dimension_numbers = #tpu.dot_dimension_numbers<[1], [0], [0], [1], [0, 0, 1, 1], [], []>} : vector<8x128xf32>, vector<128x16xf32>, vector<8x16xf32> -> vector<8x16xf32>
    %c0_9 = arith.constant 0 : index
    %c0_10 = arith.constant 0 : index
    %10 = vector.load %arg5[%c0_9, %c0_10] : memref<1x16xf32, #tpu.memory_space<vmem>>, vector<1x16xf32>
    %11 = vector.broadcast %10 : vector<1x16xf32> to vector<8x16xf32>
    %12 = arith.addf %9, %11 : vector<8x16xf32>
    %13 = arith.negf %12 : vector<8x16xf32>
    %14 = math.exp %13 : vector<8x16xf32>
    %cst_11 = arith.constant 1.000000e+00 : f32
    %15 = vector.broadcast %cst_11 : f32 to vector<8x16xf32>
    %16 = arith.addf %15, %14 : vector<8x16xf32>
    %17 = arith.divf %15, %16 : vector<8x16xf32>
    %c0_12 = arith.constant 0 : index
    %c0_13 = arith.constant 0 : index
    %18 = vector.load %arg6[%c0_12, %c0_13] : memref<8x16xf32, #tpu.memory_space<vmem>>, vector<8x16xf32>
    tpu.vector_store %arg6[%c0_12, %c0_13], %17 {strides = array<i32>} : memref<8x16xf32, #tpu.memory_space<vmem>>, vector<8x16xf32>,
    return
  }
  func.func @transform_0(%arg0: i32) -> (i32, i32) {
    %c0_i32 = arith.constant 0 : i32
    %c0_i32_0 = arith.constant 0 : i32
    return %arg0, %c0_i32 : i32, i32
  }
  func.func @transform_1(%arg0: i32) -> (i32, i32) {
    %c0_i32 = arith.constant 0 : i32
    %c0_i32_0 = arith.constant 0 : i32
    %c0_i32_1 = arith.constant 0 : i32
    return %c0_i32, %c0_i32_0 : i32, i32
  }
  func.func @transform_2(%arg0: i32) -> (i32, i32) {
    %c0_i32 = arith.constant 0 : i32
    %c0_i32_0 = arith.constant 0 : i32
    %c0_i32_1 = arith.constant 0 : i32
    return %c0_i32, %c0_i32_0 : i32, i32
  }
  func.func @transform_3(%arg0: i32) -> (i32, i32) {
    %c0_i32 = arith.constant 0 : i32
    %c0_i32_0 = arith.constant 0 : i32
    %c0_i32_1 = arith.constant 0 : i32
    return %c0_i32, %c0_i32_0 : i32, i32
  }
  func.func @transform_4(%arg0: i32) -> (i32, i32) {
    %c0_i32 = arith.constant 0 : i32
    %c0_i32_0 = arith.constant 0 : i32
    %c0_i32_1 = arith.constant 0 : i32
    return %c0_i32, %c0_i32_0 : i32, i32
  }
  func.func @transform_5(%arg0: i32) -> (i32, i32) {
    %c0_i32 = arith.constant 0 : i32
    %c0_i32_0 = arith.constant 0 : i32
    return %arg0, %c0_i32 : i32, i32
  }
}

</mosaic_0001>

<bundles_post_ra>
// kernel: tpu_custom_call.1
= control target key start
LH: loop header
LB: loop body
LE: loop exit
PB: predicated region body
PF: predicated region fallthrough
CT: control target
= control target key end

     0   :  { %v345_v2 = vmov 0.0|0.0   ;;  %vm346_vm0 = vmmov 0   ;;  %v347_v4 = vmov 0.0   ;;  %vm31_vm1 = vcmask 130048   ;;  %s456_s0 = inlined_call_operand.vmem [shape: f32[8,16], index: 0, kind: input, shape index: {}]   ;;  %s457_s1 = inlined_call_operand.vmem [shape: f32[16,128], index: 1, kind: input, shape index: {}]   ;;  %s458_s2 = inlined_call_operand.vmem [shape: f32[1,128], index: 2, kind: input, shape index: {}]   ;;  %s459_s3 = inlined_call_operand.vmem [shape: f32[128,16], index: 3, kind: input, shape index: {}]   ;;  %s460_s4 = inlined_call_operand.vmem [shape: f32[1,16], index: 4, kind: input, shape index: {}]   ;;  %s461_s5 = inlined_call_operand.hbm [shape: f32[8,16], index: 5, kind: output, shape index: {}]  }
   0x1   :  { %v22_v0 = vld [vmem:[%s457_s1] sm:$0xff]  ;;  %v23_v1 = vld [vmem:[%s457_s1 + $0x8] sm:$0xff]  ;;  %286 = vmatprep.subr.bf16.mxu0 %v345_v2  ;;  %248 = vmatprep.mubr.msk.f32.mxu0 %vm346_vm0, %v347_v4  ;;  %v108_v7 = vld [vmem:[%s459_s3 + $0x10] sm:$0xff] }
   0x2   :  { %v287_v3 = vpack.c.bf16 %v23_v1, %v22_v0  ;;  %v106_v5 = vld [vmem:[%s459_s3] sm:$0xff]  ;;  %v107_v6 = vld [vmem:[%s459_s3 + $0x8] sm:$0xff]  ;;  %289 = vmatprep.subr.bf16.mxu1 %v345_v2  ;;  %v109_v9 = vld [vmem:[%s459_s3 + $0x18] sm:$0xff]  ;;  %283 = vmatprep.mubr.msk.f32.mxu1 %vm346_vm0, %v347_v4 }
   0x3   :  { %v290_v8 = vpack.c.bf16 %v107_v6, %v106_v5  ;;  %v21_v10 = vld [vmem:[%s456_s0] sm:$0xff]  ;;  %v293_v11 = vpack.c.bf16 %v109_v9, %v108_v7  ;;  %v111_v13 = vld [vmem:[%s459_s3 + $0x28] sm:$0xff] }
   0x4   :  { %288 = vmatpush3.bf16.msra.mxu0 %v287_v3  ;;  %v110_v12 = vld [vmem:[%s459_s3 + $0x20] sm:$0xff] }
   0x5   :  { %291 = vmatpush3.bf16.msra.mxu1 %v290_v8 }
   0x6   :  { %292 = vmatprep.subr.bf16.mxu1 %v345_v2 }
   0x7   :  { %249 = vmatmul.mubr.msk.f32.vlgmr.msra.gmra.mrb[0].mxu0 %vm31_vm1, %v21_v10 }
   0x8   :  { %10 = vsyncpa [#allocation3], 0  ;;  %v296_v14 = vpack.c.bf16 %v111_v13, %v110_v12  ;;  %v112_v15 = vld [vmem:[%s459_s3 + $0x30] sm:$0xff]  ;;  %v113_v16 = vld [vmem:[%s459_s3 + $0x38] sm:$0xff] }
   0x9   :  { %294 = vmatpush3.bf16.msra.mxu1 %v293_v11  ;;  %v299_v17 = vpack.c.bf16 %v113_v16, %v112_v15  ;;  %v114_v18 = vld [vmem:[%s459_s3 + $0x40] sm:$0xff]  ;;  %v115_v19 = vld [vmem:[%s459_s3 + $0x48] sm:$0xff]  ;;  %v116_v21 = vld [vmem:[%s459_s3 + $0x50] sm:$0xff] }
   0xa   :  { %295 = vmatprep.subr.bf16.mxu1 %v345_v2  ;;  %v302_v20 = vpack.c.bf16 %v115_v19, %v114_v18  ;;  %v117_v22 = vld [vmem:[%s459_s3 + $0x58] sm:$0xff]  ;;  %v118_v24 = vld [vmem:[%s459_s3 + $0x60] sm:$0xff]  ;;  %v119_v25 = vld [vmem:[%s459_s3 + $0x68] sm:$0xff] }
   0xb   :  { %v305_v23 = vpack.c.bf16 %v117_v22, %v116_v21  ;;  %v308_v26 = vpack.c.bf16 %v119_v25, %v118_v24  ;;  %v120_v27 = vld [vmem:[%s459_s3 + $0x70] sm:$0xff]  ;;  %v121_v28 = vld [vmem:[%s459_s3 + $0x78] sm:$0xff]  ;;  %v220_v30 = vld [vmem:[%s458_s2] ss:$0 sm:$0xff]  ;;  %s348_s3 = smov [#allocation2]  }
   0xc   :  { %v311_v29 = vpack.c.bf16 %v121_v28, %v120_v27  ;;  %v222_v35 = vld [vmem:[%s460_s4] ss:$0 sm:$0xff]  ;;  %s212_s7 = sshll.u32 %s348_s3, 4  ;;  %s213_s7 = int_to_ptr.vmem [resolvable:$true] %s212_s7 }
   0xd   :  { %297 = vmatpush3.bf16.msra.mxu1 %v296_v14  ;;  %s321_s2 = scalar_lea.vmem %s213_s7, 128  ;;  %p326_p1 = scmp.lt.s32.totalorder %s213_s7, %s213_s7 }
   0xe   :  { %298 = vmatprep.subr.bf16.mxu1 %v345_v2  ;;  %p322_p0 = scmp.ne.s32.totalorder %s213_s7, %s321_s2  ;;  %p327_p2 = scmp.lt.s32.totalorder %s321_s2, %s321_s2 }
  0x10   :  { %p328_p3 = por %p327_p2, %p326_p1 }
  0x11   :  { %300 = vmatpush3.bf16.msra.mxu1 %v299_v17 }
  0x12   :  { %301 = vmatprep.subr.bf16.mxu1 %v345_v2  ;;  %p329_p4 = pnand %p328_p3, %p322_p0 }
  0x15   :  { %303 = vmatpush3.bf16.msra.mxu1 %v302_v20 }
  0x16   :  { %304 = vmatprep.subr.bf16.mxu1 %v345_v2 }
  0x19   :  { %306 = vmatpush3.bf16.msra.mxu1 %v305_v23 }
  0x1a   :  { %307 = vmatprep.subr.bf16.mxu1 %v345_v2 }
  0x1d   :  { %309 = vmatpush3.bf16.msra.mxu1 %v308_v26 }
  0x1e   :  { %310 = vmatprep.subr.bf16.mxu1 %v345_v2 }
  0x21   :  { %312 = vmatpush3.bf16.msra.mxu1 %v311_v29 }
  0xda   :  { %v101_v31 = vpop.f32.mrb[0].mxu0 }
  0xdb   :  { %v102_v32 = vadd.f32 %v220_v30, %v101_v31  ;;  %v250_v33 = vpop.f32.mrb[1].mxu0 }
  0xdd   :  { %v105_v34 = vmax.f32 %v102_v32, 0.0 }
  0xdf   :  { %284 = vmatmul.mubr.f32.vlgmr.msra.gmra.mrb[0].mxu1 %v105_v34 }
 0x1b2   :  { %v195_v36 = vpop.f32.mrb[0].mxu1 }
 0x1b3   :  { %v196_v37 = vadd.f32 %v222_v35, %v195_v36  ;;  %v285_v38 = vpop.f32.mrb[1].mxu1 }
 0x1b5   :  { %v223_v39 = vmul.f32 -1.442695, %v196_v37 }
 0x1b7   :  { %317 = vpow2.f32 %v223_v39 }
 0x1c1   :  { %v318_v40 = vpop.eup %317 }
 0x1c2   :  { %v202_v41 = vadd.f32 1.0, %v318_v40 }
 0x1c4   :  { %319 = vrcp.f32 %v202_v41 }
 0x1ce   :  { %v320_v42 = vpop.eup %319 }
 0x1cf   :  { %205 = vst.msk [vmem:[#allocation2] sm:$0xff] %vm31_vm1, %v320_v42 }
 0x1d0   :  { %332 = shalt.err (!%p329_p4)
}
 0x1d1   :  { %s333_s9 = scalar_lea.hbm %s461_s5, 128 }
 0x1d2   :  { %p334_p5 = scmp.ne.s32.totalorder %s461_s5, %s333_s9  ;;  %p337_p6 = scmp.lt.u32.totalorder %s333_s9, %s461_s5 }
 0x1d4   :  { %p339_p7 = pnand %p337_p6, %p334_p5 }
 0x1d6   :  { %342 = shalt.err (!%p339_p7)
}
 0x1d7   :  { %215 = dma.vmem_to_hbm [thread:$0]  %s213_s7, 128, %s461_s5, [#allocation3]  }
 0x1d8   :  { %343 = dma.done.wait [#allocation3], 128  }
 0x1d9   :  { %344 = vsyncadd [#allocation3], 4294967168 }
 0x1da   :  { %219 = vsyncpa [#allocation3], 1 }

</bundles_post_ra>
